<compile_context>
chip_gen: v6e
topology: v6e:2x2x1
jax: 0.10.0
libtpu: 0.0.40
codegen_flags: <defaults>
</compile_context>

<pallas_src>
import numpy as np
import jax
import jax.numpy as jnp
from jax import lax
from jax.experimental import pallas as pl
from jax.experimental.pallas import tpu as pltpu


def _round_up(x, m):
    return (x + m - 1) // m * m


# ----------------------------------------------------------------------------
# Pallas kernel: whole TemporalBlock forward on a lane-folded slab
# ----------------------------------------------------------------------------
def make_temporal_block_kernel(K, dilation, L, P, T_out, matmul_dtype):
    def causal_stack(v, in_pad):
        # v: (C, W) f32 slab; lane m holds sequence position (m - in_pad); the first
        # `in_pad` lanes are zeros (causal halo). Returns the K dilated causal taps
        # for a conv whose output has width W - P, stacked along the sublane
        # (contraction) axis: (K*C, W - P), cast to the MXU input dtype.
        C, W = v.shape
        out_w = W - P
        # position of each output lane within its length-L folded batch segment
        pos = (lax.broadcasted_iota(jnp.int32, (C, out_w), 1) - (in_pad - P)) % L
        taps = []
        for k in range(K):
            s = P - k * dilation                       # causal shift of tap k
            tap = v[:, k * dilation:k * dilation + out_w]
            if s > 0:
                # zero the first s positions of every folded batch segment so a tap
                # never reads across a segment boundary (this IS the causal pad).
                tap = jnp.where(pos >= s, tap, 0.0)
            taps.append(tap)
        return jnp.concatenate(taps, axis=0).astype(matmul_dtype)

    def kernel(x_ref, w1_ref, b1_ref, w2_ref, b2_ref, wd_ref, bd_ref, o_ref):
        x = x_ref[...]                                  # (C_in_p, T_out + 2P)
        x_f32 = x.astype(jnp.float32)

        # ---- conv1: one MXU matmul, contraction = K*C_in_p, f32 accumulation ----
        xs = causal_stack(x_f32, 2 * P)                 # (K*C_in_p, T_out + P)
        h = jnp.dot(w1_ref[...], xs, preferred_element_type=jnp.float32)
        h = h + b1_ref[...]                             # (C_out_p, T_out + P) f32

        # First P lanes of h were evaluated inside the causal halo -> zero them so
        # they act as conv2's causal zero pad (no VMEM staging buffer needed).
        lane = lax.broadcasted_iota(jnp.int32, h.shape, 1)
        h = jnp.where(lane >= P, h, 0.0)

        # ---- conv2: same im2col trick on the register-resident h ----
        hs = causal_stack(h, P)                         # (K*C_out_p, T_out)
        y = jnp.dot(w2_ref[...], hs, preferred_element_type=jnp.float32)
        y = y + b2_ref[...]                             # (C_out_p, T_out) f32

        # ---- residual: 1x1 downsample conv on the unpadded input ----
        res = jnp.dot(wd_ref[...], x[:, 2 * P:2 * P + T_out],
                      preferred_element_type=jnp.float32) + bd_ref[...]

        o_ref[...] = jnp.tanh(y + res)                  # lane-dense, unmasked store

    return kernel


# ----------------------------------------------------------------------------
# Wrapper: layout plumbing + pallas_call
# ----------------------------------------------------------------------------
def temporal_block(x, w1, b1, w2, b2, wd, bd, *, kernel_size, dilation,
                   matmul_dtype=jnp.float32):
    N, C_in, L = x.shape
    C_out = w1.shape[0]
    K = kernel_size
    P = (K - 1) * dilation                     # chomp size == causal pad per conv
    f32 = jnp.float32

    SUB, LANE = 8, 128
    C_in_p = _round_up(C_in, SUB)
    C_out_p = _round_up(C_out, SUB)
    T = N * L
    T_out = _round_up(T, LANE)                 # lane-dense output width
    W_in = T_out + 2 * P                       # 2-conv causal receptive-field halo

    # Layout plumbing (single host-side relayout): fold batch into the lane axis,
    # prepend the 2P-lane causal halo, pad channels to a sublane multiple.
    xt = jnp.transpose(x, (1, 0, 2)).reshape(C_in, T)
    x_w = jnp.zeros((C_in_p, W_in), f32).at[:C_in, 2 * P:2 * P + T].set(xt)
    x_w = x_w.astype(matmul_dtype)

    def pack_conv_weight(w, c_in_p):           # (C_out, C_in, K) -> (C_out_p, K*c_in_p)
        c_out, c_in, _ = w.shape
        wp = jnp.zeros((C_out_p, c_in_p, K), f32).at[:c_out, :c_in, :].set(w)
        return jnp.transpose(wp, (0, 2, 1)).reshape(C_out_p, K * c_in_p).astype(matmul_dtype)

    def pack_bias(b):
        return jnp.zeros((C_out_p, 1), f32).at[:C_out, 0].set(b)

    w1_p = pack_conv_weight(w1.astype(f32), C_in_p)
    w2_p = pack_conv_weight(w2.astype(f32), C_out_p)
    wd_p = jnp.zeros((C_out_p, C_in_p), f32).at[:C_out, :C_in].set(wd).astype(matmul_dtype)
    b1_p, b2_p, bd_p = pack_bias(b1), pack_bias(b2), pack_bias(bd)

    kernel = make_temporal_block_kernel(K, dilation, L, P, T_out, matmul_dtype)

    # explicit VMEM budget (tiny blocks; generous headroom, capped for v7x's 64 MiB)
    block_bytes = 4 * (C_in_p * W_in
                       + C_out_p * (K * C_in_p + K * C_out_p + C_in_p + 3 + T_out)
                       + K * (C_in_p + C_out_p) * W_in + 2 * C_out_p * W_in)
    vmem_limit = int(min(max(4 * 1024 * 1024, 8 * block_bytes), 32 * 1024 * 1024))

    grid_spec = pltpu.PrefetchScalarGridSpec(
        num_scalar_prefetch=0,
        grid=(1,),                              # whole (small) problem in one fat step
        in_specs=[
            pl.BlockSpec((C_in_p, W_in), lambda i: (0, 0)),            # x slab
            pl.BlockSpec((C_out_p, K * C_in_p), lambda i: (0, 0)),     # w1 (im2col)
            pl.BlockSpec((C_out_p, 1), lambda i: (0, 0)),              # b1
            pl.BlockSpec((C_out_p, K * C_out_p), lambda i: (0, 0)),    # w2 (im2col)
            pl.BlockSpec((C_out_p, 1), lambda i: (0, 0)),              # b2
            pl.BlockSpec((C_out_p, C_in_p), lambda i: (0, 0)),         # wd (1x1)
            pl.BlockSpec((C_out_p, 1), lambda i: (0, 0)),              # bd
        ],
        out_specs=pl.BlockSpec((C_out_p, T_out), lambda i: (0, 0)),
    )
    # TODO(synk): for long sequences / large batches, tile the folded lane axis with a
    # 2P-lane halo (grid over lane tiles, "parallel") instead of a single step.

    out = pl.pallas_call(
        kernel,
        out_shape=jax.ShapeDtypeStruct((C_out_p, T_out), f32),
        grid_spec=grid_spec,
        compiler_params=pltpu.CompilerParams(
            dimension_semantics=("parallel",),
            vmem_limit_bytes=vmem_limit,
        ),
    )(x_w, w1_p, b1_p, w2_p, b2_p, wd_p, bd_p)

    # unfold: (C_out_p, T_out) -> (N, C_out, L)
    return jnp.transpose(out[:C_out, :T].reshape(C_out, N, L), (1, 0, 2))


# ----------------------------------------------------------------------------
# Helpers: weight-norm (PyTorch weight_norm, dim=0) and a pure-JAX reference
# ----------------------------------------------------------------------------
def apply_weight_norm(v, g):
    # w = g * v / ||v||, norm over all dims except dim 0 (out channels)
    norm = jnp.sqrt(jnp.sum(v * v, axis=(1, 2), keepdims=True))
    return g * v / norm


def ref_forward(x, w1, b1, w2, b2, wd, bd, *, kernel_size, dilation):
    K = kernel_size
    P = (K - 1) * dilation
    L = x.shape[2]
    dn = ('NCH', 'OIH', 'NCH')

    def conv(inp, w, pad, dil):
        return lax.conv_general_dilated(inp, w, window_strides=(1,),
                                        padding=[(pad, pad)], rhs_dilation=(dil,),
                                        dimension_numbers=dn)

    y = conv(x, w1, P, dilation)[:, :, :L] + b1[None, :, None]   # conv1 + chomp
    y = conv(y, w2, P, dilation)[:, :, :L] + b2[None, :, None]   # conv2 + chomp
    res = conv(x, wd[:, :, None], 0, 1) + bd[None, :, None]      # 1x1 downsample
    return jnp.tanh(y + res)


# ----------------------------------------------------------------------------
if __name__ == "__main__":
    # TemporalBlock(n_inputs=4, n_outputs=8, kernel_size=3, stride=1, dilation=2,
    #               padding_size=0, dimensions=1)
    N, C_in, C_out, L = 2, 4, 8, 16
    K, dilation = 3, 2

    keys = jax.random.split(jax.random.PRNGKey(0), 9)
    x = jax.random.normal(keys[0], (N, C_in, L), jnp.float32)

    # deterministic synthetic weight-norm parameters (v, g) and biases
    v1 = jax.random.normal(keys[1], (C_out, C_in, K), jnp.float32) * 0.1
    g1 = 1.0 + 0.1 * jax.random.normal(keys[2], (C_out, 1, 1), jnp.float32)
    b1 = jax.random.normal(keys[3], (C_out,), jnp.float32) * 0.1
    v2 = jax.random.normal(keys[4], (C_out, C_out, K), jnp.float32) * 0.1
    g2 = 1.0 + 0.1 * jax.random.normal(keys[5], (C_out, 1, 1), jnp.float32)
    b2 = jax.random.normal(keys[6], (C_out,), jnp.float32) * 0.1
    wd = jax.random.normal(keys[7], (C_out, C_in), jnp.float32) * 0.1
    bd = jax.random.normal(keys[8], (C_out,), jnp.float32) * 0.1

    w1 = apply_weight_norm(v1, g1)
    w2 = apply_weight_norm(v2, g2)

    ref = ref_forward(x, w1, b1, w2, b2, wd, bd, kernel_size=K, dilation=dilation)

    # f32 MXU path (tight check)
    out = jax.block_until_ready(
        temporal_block(x, w1, b1, w2, b2, wd, bd,
                       kernel_size=K, dilation=dilation, matmul_dtype=jnp.float32))
    assert out.shape == (N, C_out, L)
    np.testing.assert_allclose(np.asarray(out), np.asarray(ref), atol=1e-5, rtol=1e-5)

    # bf16 MXU operands, f32 accumulation (v6e/v7x fast path; loose check)
    out_bf16 = jax.block_until_ready(
        temporal_block(x, w1, b1, w2, b2, wd, bd,
                       kernel_size=K, dilation=dilation, matmul_dtype=jnp.bfloat16))
    np.testing.assert_allclose(np.asarray(out_bf16), np.asarray(ref), atol=5e-2, rtol=5e-2)

    print("KERNEL_OK")
</pallas_src>

<mosaic_0001>
module attributes {stable_mosaic.version = 11 : i64} {
  func.func @kernel(%arg0: i32, %arg1: memref<8x136xf32, #tpu.memory_space<vmem>>, %arg2: memref<8x24xf32, #tpu.memory_space<vmem>>, %arg3: memref<8x1xf32, #tpu.memory_space<vmem>>, %arg4: memref<8x24xf32, #tpu.memory_space<vmem>>, %arg5: memref<8x1xf32, #tpu.memory_space<vmem>>, %arg6: memref<8x8xf32, #tpu.memory_space<vmem>>, %arg7: memref<8x1xf32, #tpu.memory_space<vmem>>, %arg8: memref<8x128xf32, #tpu.memory_space<vmem>>) attributes {dimension_semantics = [#tpu.dimension_semantics<parallel>], iteration_bounds = array<i64: 1>, scalar_prefetch = 0 : i64, scratch_operands = 0 : i64, tpu.core_type = #tpu.core_type<tc>, window_params = [{pipeline_mode = #tpu.pipeline_mode<synchronous>, transform_indices = @transform_0, window_bounds = array<i64: 8, 136>}, {pipeline_mode = #tpu.pipeline_mode<synchronous>, transform_indices = @transform_1, window_bounds = array<i64: 8, 24>}, {pipeline_mode = #tpu.pipeline_mode<synchronous>, transform_indices = @transform_2, window_bounds = array<i64: 8, 1>}, {pipeline_mode = #tpu.pipeline_mode<synchronous>, transform_indices = @transform_3, window_bounds = array<i64: 8, 24>}, {pipeline_mode = #tpu.pipeline_mode<synchronous>, transform_indices = @transform_4, window_bounds = array<i64: 8, 1>}, {pipeline_mode = #tpu.pipeline_mode<synchronous>, transform_indices = @transform_5, window_bounds = array<i64: 8, 8>}, {pipeline_mode = #tpu.pipeline_mode<synchronous>, transform_indices = @transform_6, window_bounds = array<i64: 8, 1>}, {pipeline_mode = #tpu.pipeline_mode<synchronous>, transform_indices = @transform_7, window_bounds = array<i64: 8, 128>}]} {
    %c0 = arith.constant 0 : index
    %c0_0 = arith.constant 0 : index
    %0 = vector.load %arg1[%c0, %c0_0] : memref<8x136xf32, #tpu.memory_space<vmem>>, vector<8x136xf32>
    %1 = tpu.iota {dimensions = array<i32: 1>} : vector<8x132xi32>
    %c4_i32 = arith.constant 4 : i32
    %2 = vector.broadcast %c4_i32 : i32 to vector<8x132xi32>
    %3 = arith.subi %1, %2 : vector<8x132xi32>
    %c16_i32 = arith.constant 16 : i32
    %c0_i32 = arith.constant 0 : i32
    %4 = arith.cmpi eq, %c16_i32, %c0_i32 : i32
    %c1_i32 = arith.constant 1 : i32
    %5 = arith.select %4, %c1_i32, %c16_i32 : i32
    %6 = vector.broadcast %5 : i32 to vector<8x132xi32>
    %7 = arith.remsi %3, %6 : vector<8x132xi32>
    %c0_i32_1 = arith.constant 0 : i32
    %8 = vector.broadcast %c0_i32_1 : i32 to vector<8x132xi32>
    %9 = arith.cmpi ne, %7, %8 : vector<8x132xi32>
    %c0_i32_2 = arith.constant 0 : i32
    %10 = vector.broadcast %c0_i32_2 : i32 to vector<8x132xi32>
    %11 = arith.cmpi slt, %7, %10 : vector<8x132xi32>
    %c0_i32_3 = arith.constant 0 : i32
    %12 = arith.cmpi slt, %5, %c0_i32_3 : i32
    %13 = vector.broadcast %12 : i1 to vector<8x132xi1>
    %14 = vector.broadcast %13 : vector<8x132xi1> to vector<8x132xi1>
    %15 = arith.xori %11, %14 : vector<8x132xi1>
    %16 = arith.andi %15, %9 : vector<8x132xi1>
    %17 = vector.broadcast %5 : i32 to vector<8x132xi32>
    %18 = arith.addi %7, %17 : vector<8x132xi32>
    %19 = arith.select %16, %18, %7 : vector<8x132xi1>, vector<8x132xi32>
    %20 = vector.extract_strided_slice %0 {offsets = [0, 0], sizes = [8, 132], strides = [1, 1]} : vector<8x136xf32> to vector<8x132xf32>
    %c4_i32_4 = arith.constant 4 : i32
    %21 = vector.broadcast %c4_i32_4 : i32 to vector<8x132xi32>
    %22 = arith.cmpi sge, %19, %21 : vector<8x132xi32>
    %cst = arith.constant 0.000000e+00 : f32
    %23 = vector.broadcast %cst : f32 to vector<8x132xf32>
    %24 = arith.select %22, %20, %23 : vector<8x132xi1>, vector<8x132xf32>
    %25 = vector.extract_strided_slice %0 {offsets = [0, 2], sizes = [8, 132], strides = [1, 1]} : vector<8x136xf32> to vector<8x132xf32>
    %c2_i32 = arith.constant 2 : i32
    %26 = vector.broadcast %c2_i32 : i32 to vector<8x132xi32>
    %27 = arith.cmpi sge, %19, %26 : vector<8x132xi32>
    %cst_5 = arith.constant 0.000000e+00 : f32
    %28 = vector.broadcast %cst_5 : f32 to vector<8x132xf32>
    %29 = arith.select %27, %25, %28 : vector<8x132xi1>, vector<8x132xf32>
    %30 = vector.extract_strided_slice %0 {offsets = [0, 4], sizes = [8, 132], strides = [1, 1]} : vector<8x136xf32> to vector<8x132xf32>
    %31 = tpu.concatenate %24, %29, %30 in 0 : vector<8x132xf32>, vector<8x132xf32>, vector<8x132xf32> -> vector<24x132xf32>
    %c0_6 = arith.constant 0 : index
    %c0_7 = arith.constant 0 : index
    %32 = vector.load %arg2[%c0_6, %c0_7] : memref<8x24xf32, #tpu.memory_space<vmem>>, vector<8x24xf32>
    %cst_8 = arith.constant dense<0.000000e+00> : vector<8x132xf32>
    %33 = tpu.matmul %32, %31, %cst_8 {dimension_numbers = #tpu.dot_dimension_numbers<[1], [0], [0], [1], [0, 0, 1, 1], [], []>} : vector<8x24xf32>, vector<24x132xf32>, vector<8x132xf32> -> vector<8x132xf32>
    %c0_9 = arith.constant 0 : index
    %c0_10 = arith.constant 0 : index
    %34 = vector.load %arg3[%c0_9, %c0_10] : memref<8x1xf32, #tpu.memory_space<vmem>>, vector<8x1xf32>
    %35 = vector.broadcast %34 : vector<8x1xf32> to vector<8x132xf32>
    %36 = arith.addf %33, %35 : vector<8x132xf32>
    %37 = tpu.iota {dimensions = array<i32: 1>} : vector<8x132xi32>
    %c4_i32_11 = arith.constant 4 : i32
    %38 = vector.broadcast %c4_i32_11 : i32 to vector<8x132xi32>
    %39 = arith.cmpi sge, %37, %38 : vector<8x132xi32>
    %cst_12 = arith.constant 0.000000e+00 : f32
    %40 = vector.broadcast %cst_12 : f32 to vector<8x132xf32>
    %41 = arith.select %39, %36, %40 : vector<8x132xi1>, vector<8x132xf32>
    %42 = tpu.iota {dimensions = array<i32: 1>} : vector<8x128xi32>
    %c0_i32_13 = arith.constant 0 : i32
    %43 = vector.broadcast %c0_i32_13 : i32 to vector<8x128xi32>
    %44 = arith.subi %42, %43 : vector<8x128xi32>
    %c16_i32_14 = arith.constant 16 : i32
    %c0_i32_15 = arith.constant 0 : i32
    %45 = arith.cmpi eq, %c16_i32_14, %c0_i32_15 : i32
    %c1_i32_16 = arith.constant 1 : i32
    %46 = arith.select %45, %c1_i32_16, %c16_i32_14 : i32
    %47 = vector.broadcast %46 : i32 to vector<8x128xi32>
    %48 = arith.remsi %44, %47 : vector<8x128xi32>
    %c0_i32_17 = arith.constant 0 : i32
    %49 = vector.broadcast %c0_i32_17 : i32 to vector<8x128xi32>
    %50 = arith.cmpi ne, %48, %49 : vector<8x128xi32>
    %c0_i32_18 = arith.constant 0 : i32
    %51 = vector.broadcast %c0_i32_18 : i32 to vector<8x128xi32>
    %52 = arith.cmpi slt, %48, %51 : vector<8x128xi32>
    %c0_i32_19 = arith.constant 0 : i32
    %53 = arith.cmpi slt, %46, %c0_i32_19 : i32
    %54 = vector.broadcast %53 : i1 to vector<8x128xi1>
    %55 = vector.broadcast %54 : vector<8x128xi1> to vector<8x128xi1>
    %56 = arith.xori %52, %55 : vector<8x128xi1>
    %57 = arith.andi %56, %50 : vector<8x128xi1>
    %58 = vector.broadcast %46 : i32 to vector<8x128xi32>
    %59 = arith.addi %48, %58 : vector<8x128xi32>
    %60 = arith.select %57, %59, %48 : vector<8x128xi1>, vector<8x128xi32>
    %61 = vector.extract_strided_slice %41 {offsets = [0, 0], sizes = [8, 128], strides = [1, 1]} : vector<8x132xf32> to vector<8x128xf32>
    %c4_i32_20 = arith.constant 4 : i32
    %62 = vector.broadcast %c4_i32_20 : i32 to vector<8x128xi32>
    %63 = arith.cmpi sge, %60, %62 : vector<8x128xi32>
    %cst_21 = arith.constant 0.000000e+00 : f32
    %64 = vector.broadcast %cst_21 : f32 to vector<8x128xf32>
    %65 = arith.select %63, %61, %64 : vector<8x128xi1>, vector<8x128xf32>
    %66 = vector.extract_strided_slice %41 {offsets = [0, 2], sizes = [8, 128], strides = [1, 1]} : vector<8x132xf32> to vector<8x128xf32>
    %c2_i32_22 = arith.constant 2 : i32
    %67 = vector.broadcast %c2_i32_22 : i32 to vector<8x128xi32>
    %68 = arith.cmpi sge, %60, %67 : vector<8x128xi32>
    %cst_23 = arith.constant 0.000000e+00 : f32
    %69 = vector.broadcast %cst_23 : f32 to vector<8x128xf32>
    %70 = arith.select %68, %66, %69 : vector<8x128xi1>, vector<8x128xf32>
    %71 = vector.extract_strided_slice %41 {offsets = [0, 4], sizes = [8, 128], strides = [1, 1]} : vector<8x132xf32> to vector<8x128xf32>
    %72 = tpu.concatenate %65, %70, %71 in 0 : vector<8x128xf32>, vector<8x128xf32>, vector<8x128xf32> -> vector<24x128xf32>
    %c0_24 = arith.constant 0 : index
    %c0_25 = arith.constant 0 : index
    %73 = vector.load %arg4[%c0_24, %c0_25] : memref<8x24xf32, #tpu.memory_space<vmem>>, vector<8x24xf32>
    %cst_26 = arith.constant dense<0.000000e+00> : vector<8x128xf32>
    %74 = tpu.matmul %73, %72, %cst_26 {dimension_numbers = #tpu.dot_dimension_numbers<[1], [0], [0], [1], [0, 0, 1, 1], [], []>} : vector<8x24xf32>, vector<24x128xf32>, vector<8x128xf32> -> vector<8x128xf32>
    %c0_27 = arith.constant 0 : index
    %c0_28 = arith.constant 0 : index
    %75 = vector.load %arg5[%c0_27, %c0_28] : memref<8x1xf32, #tpu.memory_space<vmem>>, vector<8x1xf32>
    %76 = vector.broadcast %75 : vector<8x1xf32> to vector<8x128xf32>
    %77 = arith.addf %74, %76 : vector<8x128xf32>
    %c0_29 = arith.constant 0 : index
    %c0_30 = arith.constant 0 : index
    %78 = vector.load %arg6[%c0_29, %c0_30] : memref<8x8xf32, #tpu.memory_space<vmem>>, vector<8x8xf32>
    %79 = vector.extract_strided_slice %0 {offsets = [0, 8], sizes = [8, 128], strides = [1, 1]} : vector<8x136xf32> to vector<8x128xf32>
    %cst_31 = arith.constant dense<0.000000e+00> : vector<8x128xf32>
    %80 = tpu.matmul %78, %79, %cst_31 {dimension_numbers = #tpu.dot_dimension_numbers<[1], [0], [0], [1], [0, 0, 1, 1], [], []>} : vector<8x8xf32>, vector<8x128xf32>, vector<8x128xf32> -> vector<8x128xf32>
    %c0_32 = arith.constant 0 : index
    %c0_33 = arith.constant 0 : index
    %81 = vector.load %arg7[%c0_32, %c0_33] : memref<8x1xf32, #tpu.memory_space<vmem>>, vector<8x1xf32>
    %82 = vector.broadcast %81 : vector<8x1xf32> to vector<8x128xf32>
    %83 = arith.addf %80, %82 : vector<8x128xf32>
    %84 = arith.addf %77, %83 : vector<8x128xf32>
    %85 = math.tanh %84 : vector<8x128xf32>
    %c0_34 = arith.constant 0 : index
    %c0_35 = arith.constant 0 : index
    %86 = vector.load %arg8[%c0_34, %c0_35] : memref<8x128xf32, #tpu.memory_space<vmem>>, vector<8x128xf32>
    tpu.vector_store %arg8[%c0_34, %c0_35], %85 {strides = array<i32>} : memref<8x128xf32, #tpu.memory_space<vmem>>, vector<8x128xf32>,
    return
  }
  func.func @transform_0(%arg0: i32) -> (i32, i32) {
    %c0_i32 = arith.constant 0 : i32
    %c0_i32_0 = arith.constant 0 : i32
    %c0_i32_1 = arith.constant 0 : i32
    return %c0_i32, %c0_i32_0 : i32, i32
  }
  func.func @transform_1(%arg0: i32) -> (i32, i32) {
    %c0_i32 = arith.constant 0 : i32
    %c0_i32_0 = arith.constant 0 : i32
    %c0_i32_1 = arith.constant 0 : i32
    return %c0_i32, %c0_i32_0 : i32, i32
  }
  func.func @transform_2(%arg0: i32) -> (i32, i32) {
    %c0_i32 = arith.constant 0 : i32
    %c0_i32_0 = arith.constant 0 : i32
    %c0_i32_1 = arith.constant 0 : i32
    return %c0_i32, %c0_i32_0 : i32, i32
  }
  func.func @transform_3(%arg0: i32) -> (i32, i32) {
    %c0_i32 = arith.constant 0 : i32
    %c0_i32_0 = arith.constant 0 : i32
    %c0_i32_1 = arith.constant 0 : i32
    return %c0_i32, %c0_i32_0 : i32, i32
  }
  func.func @transform_4(%arg0: i32) -> (i32, i32) {
    %c0_i32 = arith.constant 0 : i32
    %c0_i32_0 = arith.constant 0 : i32
    %c0_i32_1 = arith.constant 0 : i32
    return %c0_i32, %c0_i32_0 : i32, i32
  }
  func.func @transform_5(%arg0: i32) -> (i32, i32) {
    %c0_i32 = arith.constant 0 : i32
    %c0_i32_0 = arith.constant 0 : i32
    %c0_i32_1 = arith.constant 0 : i32
    return %c0_i32, %c0_i32_0 : i32, i32
  }
  func.func @transform_6(%arg0: i32) -> (i32, i32) {
    %c0_i32 = arith.constant 0 : i32
    %c0_i32_0 = arith.constant 0 : i32
    %c0_i32_1 = arith.constant 0 : i32
    return %c0_i32, %c0_i32_0 : i32, i32
  }
  func.func @transform_7(%arg0: i32) -> (i32, i32) {
    %c0_i32 = arith.constant 0 : i32
    %c0_i32_0 = arith.constant 0 : i32
    %c0_i32_1 = arith.constant 0 : i32
    return %c0_i32, %c0_i32_0 : i32, i32
  }
}

</mosaic_0001>

<bundles_post_ra>
// kernel: tpu_custom_call.1
= control target key start
LH: loop header
LB: loop body
LE: loop exit
PB: predicated region body
PF: predicated region fallthrough
CT: control target
= control target key end

     0   :  { %12 = vsyncpa [#allocation3], 0  ;;  %s588_s0 = inlined_call_operand.vmem [shape: f32[8,136], index: 0, kind: input, shape index: {}]   ;;  %s589_s1 = inlined_call_operand.vmem [shape: f32[8,24], index: 1, kind: input, shape index: {}]   ;;  %s590_s2 = inlined_call_operand.vmem [shape: f32[8,1], index: 2, kind: input, shape index: {}]   ;;  %s591_s3 = inlined_call_operand.vmem [shape: f32[8,24], index: 3, kind: input, shape index: {}]   ;;  %s592_s4 = inlined_call_operand.vmem [shape: f32[8,1], index: 4, kind: input, shape index: {}]   ;;  %s593_s5 = inlined_call_operand.hbm [shape: f32[8,8], index: 5, kind: input, shape index: {}]   ;;  %s594_s6 = inlined_call_operand.vmem [shape: f32[8,1], index: 6, kind: input, shape index: {}]   ;;  %s595_s7 = inlined_call_operand.hbm [shape: f32[8,128], index: 7, kind: output, shape index: {}]  }
   0x1   :  { %13 = vsyncpa [#allocation4], 0  ;;  %s486_s24 = smov [#allocation2]  }
   0x2   :  { %s30_s25 = sshll.u32 %s486_s24, 4  ;;  %s31_s25 = int_to_ptr.vmem [resolvable:$true] %s30_s25 }
   0x3   :  { %s450_s26 = scalar_lea.vmem %s31_s25, 128  ;;  %p455_p1 = scmp.lt.s32.totalorder %s31_s25, %s31_s25 }
   0x4   :  { %p451_p0 = scmp.ne.s32.totalorder %s31_s25, %s450_s26  ;;  %p456_p2 = scmp.lt.s32.totalorder %s450_s26, %s450_s26 }
   0x6   :  { %p457_p3 = por %p456_p2, %p455_p1 }
   0x8   :  { %p458_p4 = pnand %p457_p3, %p451_p0 }
   0xa   :  { %461 = shalt.err (!%p458_p4)
}
   0xb   :  { %33 = dma.hbm_to_vmem [thread:$0]  %s593_s5, 128, %s31_s25, [#allocation3]  }
   0xc   :  { %482 = dma.done.wait [#allocation3], 128  }
   0xd   :  { %483 = vsyncadd [#allocation3], 4294967168  ;;  %v487_v0 = vmov 0.0   ;;  %v488_v1 = vmov 0   ;;  %v39_v2 = vld [vmem:[%s588_s0] sm:$0xff]  ;;  %s489_s8 = smov 126   ;;  %v41_v5 = vlaneseq }
   0xe   :  { %171 = vmatprep.mubr.f32.mxu0 %v487_v0  ;;  %416 = vmatprep.subr.mxu1 %v487_v0  ;;  %s490_s9 = smov 124   ;;  %v40_v3 = vld [vmem:[%s588_s0 + $0x8] sm:$0xff]  ;;  %v97_v4 = vld [vmem:[%s590_s2] sm:$0xff]  ;;  %vm92_vm4 = vcmask 1014784   ;;  %vm82_vm5 = vcmask 1031168   ;;  %vm103_vm10 = vcmask 195584  }
   0xf   :  { %438 = vset.pattern.permute.xlu0 %v488_v1  ;;  %439 = vset.pattern.permute.xlu1 %v488_v1  ;;  %v552_v6 = vand.u32 127, %v41_v5  ;;  %v96_v24 = vld [vmem:[%s589_s1] sm:$0xff]  ;;  %vm491_vm12 = vmmov 0   ;;  %s492_s1 = smov 120   ;;  %vm303_vm15 = vcmask 982016  }
  0x10   :  { %78 = vrot.lane.b32.xlu1 %v39_v2, %s489_s8  ;;  %88 = vrot.lane.b32.xlu0 %v39_v2, %s490_s9  ;;  %v213_v31 = vld [vmem:[%s592_s4] sm:$0xff] }
  0x11   :  { %v398_v7 = vadd.s32 4294967292, %v552_v6  ;;  %v43_v12 = vadd.s32 128, %v552_v6  ;;  %vm178_vm11 = vcmp.ge.s32.totalorder %v552_v6, 4  ;;  %422 = vmatprep.mubr.msk.f32.mxu1 %vm491_vm12, %v487_v0  ;;  %v293_v32 = vld [vmem:[%s594_s6] sm:$0xff]  ;;  %v186_v34 = vand.u32 15, %v552_v6 }
  0x12   :  { %v212_v41 = vld [vmem:[%s591_s3] sm:$0xff]  ;;  %s493_s3 = smov [#allocation5]  }
  0x13   :  { %v47_v8 = vsub.s32 0, %v398_v7  ;;  %vm46_vm0 = vcmp.lt.s32.totalorder %v398_v7, 0  ;;  %v399_v14 = vadd.s32 4294967292, %v43_v12  ;;  %vm196_vm13 = vcmp.ge.s32.totalorder %v186_v34, 2  ;;  %v292_v43 = vld [vmem:[#allocation2] sm:$0xff]  ;;  %s389_s17 = sshll.u32 %s493_s3, 4  ;;  %s390_s17 = int_to_ptr.vmem [resolvable:$true] %s389_s17 }
  0x14   :  { %80 = vrot.lane.b32.xlu1 %v40_v3, %s489_s8  ;;  %90 = vrot.lane.b32.xlu0 %v40_v3, %s490_s9  ;;  %vm194_vm14 = vcmp.ge.s32.totalorder %v186_v34, 4  ;;  %s462_s18 = scalar_lea.vmem %s390_s17, 128  ;;  %p467_p6 = scmp.lt.s32.totalorder %s390_s17, %s390_s17 }
  0x15   :  { %v400_v9 = vmin.u32 %v398_v7, %v47_v8  ;;  %v57_v18 = vand.u32 15, %v399_v14  ;;  %p463_p5 = scmp.ne.s32.totalorder %s390_s17, %s462_s18  ;;  %p468_p7 = scmp.lt.s32.totalorder %s462_s18, %s462_s18 }
  0x17   :  { %v50_v10 = vand.u32 15, %v400_v9  ;;  %vm75_vm6 = vcmp.ge.s32.totalorder %v57_v18, 2  ;;  %vm71_vm8 = vcmp.ge.s32.totalorder %v57_v18, 4  ;;  %p469_p8 = por %p468_p7, %p467_p6 }
  0x18   :  { %100 = vperm.xlu0 %438, %v97_v4  }
  0x19   :  { %v51_v11 = vsub.s32 0, %v50_v10  ;;  %p470_p9 = pnand %p469_p8, %p463_p5 }
  0x1b   :  { %v52_v13 = vsel %vm46_vm0, %v51_v11, %v50_v10  ;;  %vm306_vm0 = vcmask 64512  }
  0x1c   :  { %vm60_vm1 = vcmp.ne.s32.totalorder %v52_v13, 0  ;;  %vm62_vm2 = vcmp.lt.s32.totalorder %v52_v13, 0  ;;  %v66_v15 = vadd.s32 16, %v52_v13 }
  0x1d   :  { %vm64_vm3 = vmand %vm62_vm2, %vm60_vm1 }
  0x1e   :  { %v68_v19 = vsel %vm64_vm3, %v66_v15, %v52_v13 }
  0x1f   :  { %vm74_vm7 = vcmp.ge.s32.totalorder %v68_v19, 2  ;;  %vm70_vm9 = vcmp.ge.s32.totalorder %v68_v19, 4 }
  0x82   :  { %v79_v16 = vpop.permute.xlu1 %78  ;;  %v89_v17 = vpop.permute.xlu0 %88 }
  0x86   :  { %v81_v20 = vpop.permute.xlu1 %80  ;;  %v91_v21 = vpop.permute.xlu0 %90 }
  0x87   :  { %133 = vmatprep.subr.mxu0 %v91_v21  ;;  %v93_v22 = vsel %vm92_vm4, %v89_v17, %v91_v21  ;;  %v83_v23 = vsel %vm82_vm5, %v79_v16, %v81_v20 }
  0x88   :  { %134 = vmatpush1.msra.mxu0 %v93_v22 }
  0x89   :  { %401 = vmatprep.subr.msk.mxu0 %vm75_vm6, %v81_v20 }
  0x8a   :  { %402 = vmatpush1.msk.msra.mxu0 %vm74_vm7, %v83_v23 }
  0x8b   :  { %403 = vmatprep.subr.msk.mxu0 %vm71_vm8, %v40_v3 }
  0x8c   :  { %404 = vmatpush1.msk.msra.mxu0 %vm70_vm9, %v39_v2 }
  0x8d   :  { %405 = vmatmul.mubr.msk.f32.vlgmr.msra.gmra.mxu0 %vm103_vm10, %v96_v24  ;;  %425 = vmatprep.subr.mxu0 %v487_v0 }
  0x8e   :  { %427 = vmatprep.mubr.msk.f32.mxu0 %vm491_vm12, %v487_v0 }
  0x93   :  { %v101_v25 = vpop.permute.xlu0 %100 }
 0x14d   :  { %v173_v26 = vpop.f32.mrf.mxu0 }
 0x14e   :  { %v174_v27 = vadd.f32 %v173_v26, %v101_v25 }
 0x14f   :  { %v175_v28 = vpop.f32.mrf.mxu0 }
 0x150   :  { %v180_v29 = vsel %vm178_vm11, %v174_v27, 0.0  ;;  %v176_v30 = vadd.f32 %v175_v28, %v101_v25 }
 0x151   :  { %199 = vrot.lane.b32.xlu0 %v180_v29, %s489_s8  ;;  %206 = vrot.lane.b32.xlu1 %v180_v29, %s490_s9 }
 0x155   :  { %299 = vrot.lane.b32.xlu0 %v39_v2, %s492_s1  ;;  %208 = vrot.lane.b32.xlu1 %v176_v30, %s490_s9 }
 0x159   :  { %216 = vperm.xlu0 %438, %v213_v31   ;;  %201 = vrot.lane.b32.xlu1 %v176_v30, %s489_s8 }
 0x15d   :  { %301 = vrot.lane.b32.xlu1 %v40_v3, %s492_s1 }
 0x161   :  { %296 = vperm.xlu1 %439, %v293_v32  }
 0x1c3   :  { %v207_v33 = vpop.permute.xlu1 %206  ;;  %v200_v37 = vpop.permute.xlu0 %199 }
 0x1c7   :  { %v209_v35 = vpop.permute.xlu1 %208  ;;  %v300_v40 = vpop.permute.xlu0 %299 }
 0x1c8   :  { %v210_v36 = vsel %vm92_vm4, %v207_v33, %v209_v35 }
 0x1c9   :  { %417 = vmatpush3.msra.mxu1 %v210_v36 }
 0x1ca   :  { %418 = vmatprep.subr.mxu1 %v487_v0 }
 0x1cb   :  { %v202_v38 = vpop.permute.xlu1 %201 }
 0x1cc   :  { %v203_v39 = vsel %vm82_vm5, %v200_v37, %v202_v38 }
 0x1cd   :  { %419 = vmatpush3.msk.msra.mxu1 %vm196_vm13, %v203_v39 }
 0x1ce   :  { %420 = vmatprep.subr.mxu1 %v487_v0 }
 0x1cf   :  { %421 = vmatpush3.msk.msra.mxu1 %vm194_vm14, %v180_v29  ;;  %v302_v42 = vpop.permute.xlu1 %301 }
 0x1d0   :  { %v304_v44 = vsel %vm303_vm15, %v300_v40, %v302_v42  ;;  %423 = vmatmul.mubr.msk.f32.vlgmr.msra.gmra.mxu1 %vm103_vm10, %v212_v41 }
 0x1d1   :  { %426 = vmatpush3.msra.mxu0 %v304_v44 }
 0x1d2   :  { %428 = vmatmul.mubr.msk.f32.vlgmr.msra.gmra.mxu0 %vm306_vm0, %v292_v43 }
 0x1d4   :  { %v217_v47 = vpop.permute.xlu0 %216 }
 0x1dc   :  { %v297_v46 = vpop.permute.xlu1 %296 }
 0x290   :  { %v288_v45 = vpop.f32.mrf.mxu1 }
 0x291   :  { %v289_v50 = vadd.f32 %v288_v45, %v217_v47 }
 0x292   :  { %v376_v48 = vpop.f32.mrf.mxu0  ;;  %v424_v49 = vpop.f32.mrf.mxu1 }
 0x293   :  { %v377_v51 = vadd.f32 %v376_v48, %v297_v46 }
 0x294   :  { %v429_v52 = vpop.f32.mrf.mxu0 }
 0x295   :  { %v380_v53 = vadd.f32 %v377_v51, %v289_v50 }
 0x297   :  { %440 = vtanh.f32 %v380_v53 }
 0x2a4   :  { %v441_v54 = vpop.eup %440 }
 0x2a5   :  { %382 = vst [vmem:[#allocation5] sm:$0xff] %v441_v54 }
 0x2a6   :  { %473 = shalt.err (!%p470_p9)
}
 0x2a7   :  { %392 = dma.vmem_to_hbm [thread:$0]  %s390_s17, 128, %s595_s7, [#allocation4]  }
 0x2a8   :  { %484 = dma.done.wait [#allocation4], 128  }
 0x2a9   :  { %485 = vsyncadd [#allocation4], 4294967168 }
 0x2aa   :  { %396 = vsyncpa [#allocation3], 1 }
 0x2ab   :  { %397 = vsyncpa [#allocation4], 1 }

</bundles_post_ra>
